<compile_context>
chip_gen: v5e
topology: v5e:2x2
jax: 0.10.0
libtpu: 0.0.40
codegen_flags: <defaults>
</compile_context>

<pallas_src>
import jax
import jax.numpy as jnp
from jax.experimental import pallas as pl
from jax.experimental.pallas import tpu as pltpu


def _implicit_m_kernel(x_ref, s_ref, o_ref):
    # x_ref: (TM, HW) activation tile, s_ref: (TM, 1) per-row scale.
    # Pure VPU elementwise multiply; broadcast of s over the lane axis.
    o_ref[...] = x_ref[...] * s_ref[...]


def _choose_tm(bc, hw, itemsize, target_tile_bytes=512 * 1024):
    """Pick a row-tile size: ~target_tile_bytes per input tile, multiple of 8."""
    rows = max(8, target_tile_bytes // max(1, hw * itemsize))
    rows = min(rows, bc)
    if rows < bc:
        rows = max(8, (rows // 8) * 8)
    return rows


def implicit_m(x, implicit):
    """Pallas ImplicitM forward. x: (B, C, H, W); implicit: (1, C, 1, 1)."""
    b, c, h, w = x.shape
    bc, hw = b * c, h * w

    # ---- glue: layout plumbing only (reshape is free, no transpose) ----
    x2 = x.reshape(bc, hw)
    scale = jnp.tile(implicit.reshape(c).astype(x.dtype), b).reshape(bc, 1)

    tm = _choose_tm(bc, hw, jnp.dtype(x.dtype).itemsize)
    n_tiles = pl.cdiv(bc, tm)
    bc_pad = n_tiles * tm
    if bc_pad != bc:
        x2 = jnp.pad(x2, ((0, bc_pad - bc), (0, 0)))
        scale = jnp.pad(scale, ((0, bc_pad - bc), (0, 0)))

    out = pl.pallas_call(
        _implicit_m_kernel,
        out_shape=jax.ShapeDtypeStruct((bc_pad, hw), x.dtype),
        grid=(n_tiles,),
        in_specs=[
            pl.BlockSpec((tm, hw), lambda i: (i, 0)),   # activation tile
            pl.BlockSpec((tm, 1), lambda i: (i, 0)),    # per-row scale column
        ],
        out_specs=pl.BlockSpec((tm, hw), lambda i: (i, 0)),
        compiler_params=pltpu.CompilerParams(
            dimension_semantics=("parallel",)),
    )(x2, scale)

    if bc_pad != bc:
        out = out[:bc]
    return out.reshape(b, c, h, w)


# ---------------- pure-JAX reference (mirrors the PyTorch code) ----------------
def reference_implicit_m(x, implicit):
    return implicit * x


if __name__ == "__main__":
    key = jax.random.PRNGKey(0)
    k1, k2, k3, k4 = jax.random.split(key, 4)

    # Small shapes consistent with the module: batch=2, channels=4, spatial=16.
    B, C, H, W = 2, 4, 16, 16
    x = jax.random.normal(k1, (B, C, H, W), jnp.float32)
    implicit = 1.0 + 0.02 * jax.random.normal(k2, (1, C, 1, 1), jnp.float32)

    out = implicit_m(x, implicit)
    jax.block_until_ready(out)
    ref = reference_implicit_m(x, implicit)
    if not bool(jnp.allclose(out, ref, rtol=1e-6, atol=1e-6)):
        raise AssertionError("Pallas ImplicitM output mismatch vs reference (small case)")

    # Larger case that exercises the multi-tile grid / pipelining path.
    B2, C2, H2, W2 = 2, 512, 16, 16
    x2 = jax.random.normal(k3, (B2, C2, H2, W2), jnp.float32)
    implicit2 = 1.0 + 0.02 * jax.random.normal(k4, (1, C2, 1, 1), jnp.float32)

    out2 = implicit_m(x2, implicit2)
    jax.block_until_ready(out2)
    ref2 = reference_implicit_m(x2, implicit2)
    if not bool(jnp.allclose(out2, ref2, rtol=1e-6, atol=1e-6)):
        raise AssertionError("Pallas ImplicitM output mismatch vs reference (tiled case)")

    print("KERNEL_OK")
</pallas_src>

<mosaic_0001>
module attributes {stable_mosaic.version = 11 : i64} {
  func.func @_implicit_m_kernel(%arg0: i32, %arg1: memref<8x256xf32, #tpu.memory_space<vmem>>, %arg2: memref<8x1xf32, #tpu.memory_space<vmem>>, %arg3: memref<8x256xf32, #tpu.memory_space<vmem>>) attributes {dimension_semantics = [#tpu.dimension_semantics<parallel>], iteration_bounds = array<i64: 1>, scalar_prefetch = 0 : i64, scratch_operands = 0 : i64, tpu.core_type = #tpu.core_type<tc>, window_params = [{transform_indices = @transform_0, window_bounds = array<i64: 8, 256>}, {transform_indices = @transform_1, window_bounds = array<i64: 8, 1>}, {transform_indices = @transform_2, window_bounds = array<i64: 8, 256>}]} {
    %c0 = arith.constant 0 : index
    %c0_0 = arith.constant 0 : index
    %0 = vector.load %arg1[%c0, %c0_0] : memref<8x256xf32, #tpu.memory_space<vmem>>, vector<8x256xf32>
    %c0_1 = arith.constant 0 : index
    %c0_2 = arith.constant 0 : index
    %1 = vector.load %arg2[%c0_1, %c0_2] : memref<8x1xf32, #tpu.memory_space<vmem>>, vector<8x1xf32>
    %2 = vector.broadcast %1 : vector<8x1xf32> to vector<8x256xf32>
    %3 = arith.mulf %0, %2 : vector<8x256xf32>
    %c0_3 = arith.constant 0 : index
    %c0_4 = arith.constant 0 : index
    %4 = vector.load %arg3[%c0_3, %c0_4] : memref<8x256xf32, #tpu.memory_space<vmem>>, vector<8x256xf32>
    tpu.vector_store %arg3[%c0_3, %c0_4], %3 {strides = array<i32>} : memref<8x256xf32, #tpu.memory_space<vmem>>, vector<8x256xf32>,
    return
  }
  func.func @transform_0(%arg0: i32) -> (i32, i32) {
    %c0_i32 = arith.constant 0 : i32
    %c0_i32_0 = arith.constant 0 : i32
    return %arg0, %c0_i32 : i32, i32
  }
  func.func @transform_1(%arg0: i32) -> (i32, i32) {
    %c0_i32 = arith.constant 0 : i32
    %c0_i32_0 = arith.constant 0 : i32
    return %arg0, %c0_i32 : i32, i32
  }
  func.func @transform_2(%arg0: i32) -> (i32, i32) {
    %c0_i32 = arith.constant 0 : i32
    %c0_i32_0 = arith.constant 0 : i32
    return %arg0, %c0_i32 : i32, i32
  }
}

</mosaic_0001>

<bundles_post_ra>
// kernel: tpu_custom_call.1
= control target key start
LH: loop header
LB: loop body
LE: loop exit
PB: predicated region body
PF: predicated region fallthrough
CT: control target
= control target key end

     0   :  { %7 = vsyncpa [#allocation3], 0  ;;  %s138_s0 = inlined_call_operand.hbm [shape: f32[8,256], index: 0, kind: input, shape index: {}]   ;;  %s139_s1 = inlined_call_operand.vmem [shape: f32[8,1], index: 1, kind: input, shape index: {}]   ;;  %s140_s2 = inlined_call_operand.hbm [shape: f32[8,256], index: 2, kind: output, shape index: {}]  }
   0x1   :  { %8 = vsyncpa [#allocation4], 0  ;;  %s14_s11 = sshll.u32 %s138_s0, 4  ;;  %s111_s12 = smov [#allocation2]   ;;  %s15_s11 = int_to_ptr.hbm [resolvable:$true] %s14_s11 }
   0x2   :  { %s16_s13 = sshll.u32 %s111_s12, 4  ;;  %s17_s13 = int_to_ptr.vmem [resolvable:$true] %s16_s13 }
   0x3   :  { %19 = dma.hbm_to_vmem [thread:$0]  %s15_s11, 256, %s17_s13, [#allocation3]  }
   0x4   :  { %107 = dma.done.wait [#allocation3], 256  }
   0x5   :  { %108 = vsyncadd [#allocation3], 4294967040  ;;  %v112_v0 = vmov 0   ;;  %v28_v1 = vld [vmem:[%s139_s1] sm:$0xff]  ;;  %v27_v3 = vld [vmem:[#allocation2 + $0x8] sm:$0xff]  ;;  %s113_s16 = smov [#allocation5]  }
   0x6   :  { %58 = vset.pattern.permute.xlu0 %v112_v0  ;;  %v26_v2 = vld [vmem:[#allocation2] sm:$0xff]  ;;  %s43_s17 = sshll.u32 %s113_s16, 4  ;;  %s45_s19 = sshll.u32 %s140_s2, 4  ;;  %s44_s17 = int_to_ptr.vmem [resolvable:$true] %s43_s17  ;;  %s46_s19 = int_to_ptr.hbm [resolvable:$true] %s45_s19 }
   0x7   :  { %31 = vperm.xlu0 %58, %v28_v1  }
  0x79   :  { %v32_v4 = vpop.permute.xlu0 %31 }
  0x7a   :  { %v34_v5 = vmul.f32 %v32_v4, %v26_v2  ;;  %v35_v6 = vmul.f32 %v32_v4, %v27_v3 }
  0x7c   :  { %36 = vst [vmem:[#allocation5] sm:$0xff] %v34_v5 }
  0x7d   :  { %37 = vst [vmem:[#allocation5 + $0x8] sm:$0xff] %v35_v6 }
  0x7e   :  { %48 = dma.vmem_to_hbm [thread:$0]  %s44_s17, 256, %s46_s19, [#allocation4]  }
  0x7f   :  { %109 = dma.done.wait [#allocation4], 256  }
  0x80   :  { %110 = vsyncadd [#allocation4], 4294967040 }
  0x81   :  { %53 = vsyncpa [#allocation3], 1 }
  0x82   :  { %54 = vsyncpa [#allocation4], 1 }

</bundles_post_ra>
